<compile_context>
chip_gen: v5e
topology: v5e:2x2
jax: 0.10.0
libtpu: 0.0.40
codegen_flags: <defaults>
</compile_context>

<pallas_src>
import jax
import jax.numpy as jnp
import numpy as np
from jax.experimental import pallas as pl
from jax.experimental.pallas import tpu as pltpu


def _make_attention_kernel(group, dim_head, n_groups):
    d = dim_head
    gd = group * d

    def kernel(xq_ref, wq_ref, bq_ref, kt_ref, v_ref, wo_ref, bo_ref,
               o_ref, oacc_ref):
        g = pl.program_id(2)

        # Q projection for this head-group (softmax scale folded into wq/bq).
        xq = xq_ref[0]                                                # (tq, Din) bf16
        q = (jnp.dot(xq, wq_ref[0], preferred_element_type=jnp.float32)
             + bq_ref[0]).astype(jnp.bfloat16)                        # (tq, G*d)

        for hl in range(group):                                       # static unroll
            qh = q[:, hl * d:(hl + 1) * d]                            # (tq, d)
            # K is pre-transposed to (d, N) on the host -> no XLU transpose.
            s = jnp.dot(qh, kt_ref[0, hl],
                        preferred_element_type=jnp.float32)           # (tq, N) f32
            m = jnp.max(s, axis=-1, keepdims=True)
            e = jnp.exp(s - m)
            p = (e * pl.reciprocal(jnp.sum(e, axis=-1, keepdims=True),
                                   approx=True)).astype(jnp.bfloat16)
            o = jnp.dot(p, v_ref[0, hl],
                        preferred_element_type=jnp.float32)           # (tq, d) f32
            # Deferred out-projection: stash this head's slice of the
            # (tq, heads*d) pre-projection activations.
            if n_groups == 1:
                oacc_ref[:, hl * d:(hl + 1) * d] = o                  # static slice
            else:
                col = pl.multiple_of(g * gd + hl * d, d)
                oacc_ref[:, pl.ds(col, d)] = o

        @pl.when(g == n_groups - 1)
        def _flush():
            # Single full-width out-projection GEMM + bias, lane-dense store.
            y = jnp.dot(oacc_ref[...].astype(jnp.bfloat16), wo_ref[...],
                        preferred_element_type=jnp.float32) + bo_ref[...]
            o_ref[0] = y.astype(o_ref.dtype)

    return kernel


def attention_forward(x, w_qkv, b_qkv, w_out, b_out, *, heads, dim_head,
                      q_tile=128):
    # q_tile: raise to 256-512 on v5e when N / VMEM allow; 128 is a safe
    # default for v6e/v7x.
    B, N, Din = x.shape
    inner = heads * dim_head
    Dout = w_out.shape[1]
    scale = dim_head ** (-0.5)

    # ---- head grouping: largest divisor of `heads` with group*dim_head<=512
    # (bounds per-step K^T/V VMEM while keeping the Q GEMM / MXU lanes wide).
    group = 1
    for g in range(1, heads + 1):
        if heads % g == 0 and g * dim_head <= 512:
            group = g
    n_groups = heads // group
    gd = group * dim_head

    # ---- trace-time weight prep (bf16 MXU operands, f32 biases) -----------
    w_qkv_r = w_qkv.reshape(Din, 3, heads, dim_head)
    b_qkv_r = b_qkv.reshape(3, heads, 1, dim_head)

    # Q: scale folded, group-major -> (n_groups, Din, group*d)
    w_q = (w_qkv_r[:, 0] * scale).reshape(Din, n_groups, gd).transpose(1, 0, 2)
    w_q = w_q.astype(jnp.bfloat16)
    b_q = (b_qkv_r[0] * scale).reshape(n_groups, 1, gd).astype(jnp.float32)

    # K/V: precomputed ONCE per (batch, head) with a plain XLA GEMM
    # (bf16 in, f32 accumulate, bias folded). K stored pre-transposed.
    x_bf = x.astype(jnp.bfloat16)
    w_k = w_qkv_r[:, 1].transpose(1, 0, 2).astype(jnp.bfloat16)   # (h, Din, d)
    w_v = w_qkv_r[:, 2].transpose(1, 0, 2).astype(jnp.bfloat16)
    b_k = b_qkv_r[1].astype(jnp.float32)                          # (h, 1, d)
    b_v = b_qkv_r[2].astype(jnp.float32)
    k = jnp.einsum("bnc,hcd->bhnd", x_bf, w_k,
                   preferred_element_type=jnp.float32) + b_k
    v = jnp.einsum("bnc,hcd->bhnd", x_bf, w_v,
                   preferred_element_type=jnp.float32) + b_v
    kT = k.transpose(0, 1, 3, 2).astype(jnp.bfloat16)             # (B, h, d, N)
    v = v.astype(jnp.bfloat16)                                    # (B, h, N, d)

    # Out-projection: one full (inner, Dout_p) weight, Dout padded to 128
    # lanes so the output store is an unmasked vst.
    Dout_p = ((Dout + 127) // 128) * 128
    w_o = w_out.astype(jnp.float32)
    b_o = b_out.reshape(1, Dout).astype(jnp.float32)
    if Dout_p != Dout:
        w_o = jnp.pad(w_o, ((0, 0), (0, Dout_p - Dout)))
        b_o = jnp.pad(b_o, ((0, 0), (0, Dout_p - Dout)))
    w_o = w_o.astype(jnp.bfloat16)

    # ---- query tiling: pad the QUERY path only (keys stay at true N) ------
    if N >= q_tile:
        tq = q_tile
    else:
        tq = ((N + 7) // 8) * 8
    nq = -(-N // tq)
    N_pad = nq * tq
    x_q = x_bf if N_pad == N else jnp.pad(x_bf, ((0, 0), (0, N_pad - N), (0, 0)))

    kernel = _make_attention_kernel(group, dim_head, n_groups)

    out_p = pl.pallas_call(
        kernel,
        out_shape=jax.ShapeDtypeStruct((B, N_pad, Dout_p), x.dtype),
        grid=(B, nq, n_groups),
        in_specs=[
            pl.BlockSpec((1, tq, Din), lambda b, qi, g: (b, qi, 0)),        # x (query rows)
            pl.BlockSpec((1, Din, gd), lambda b, qi, g: (g, 0, 0)),         # w_q (scaled)
            pl.BlockSpec((1, 1, gd), lambda b, qi, g: (g, 0, 0)),           # b_q (scaled)
            pl.BlockSpec((1, group, dim_head, N),
                         lambda b, qi, g: (b, g, 0, 0)),                    # K^T (precomputed)
            pl.BlockSpec((1, group, N, dim_head),
                         lambda b, qi, g: (b, g, 0, 0)),                    # V   (precomputed)
            pl.BlockSpec((inner, Dout_p), lambda b, qi, g: (0, 0)),         # w_out (full)
            pl.BlockSpec((1, Dout_p), lambda b, qi, g: (0, 0)),             # b_out
        ],
        out_specs=pl.BlockSpec((1, tq, Dout_p), lambda b, qi, g: (b, qi, 0)),
        scratch_shapes=[pltpu.VMEM((tq, inner), jnp.float32)],
        compiler_params=pltpu.CompilerParams(
            dimension_semantics=("parallel", "parallel", "arbitrary"),
            # Re-budgeted after bf16 I/O + K/V precompute: 32 MiB leaves
            # headroom on v7x's 64 MiB physical VMEM per TensorCore.
            vmem_limit_bytes=32 * 1024 * 1024),
    )(x_q, w_q, b_q, kT, v, w_o, b_o)

    out = out_p
    if N_pad != N:
        out = out[:, :N, :]
    if Dout_p != Dout:
        out = out[..., :Dout]
    return out


def attention_reference(x, w_qkv, b_qkv, w_out, b_out, *, heads, dim_head):
    """Pure-JAX f32 reference mirroring the PyTorch forward."""
    B, N, _ = x.shape
    inner = heads * dim_head
    scale = dim_head ** (-0.5)
    qkv = jnp.einsum("bnc,cd->bnd", x, w_qkv) + b_qkv[0]
    q, k, v = jnp.split(qkv, 3, axis=-1)

    def to_heads(t):  # b n (h d) -> b h n d
        return t.reshape(B, N, heads, dim_head).transpose(0, 2, 1, 3)

    q, k, v = map(to_heads, (q, k, v))
    dots = jnp.einsum("bhnd,bhmd->bhnm", q, k) * scale
    attn = jax.nn.softmax(dots, axis=-1)
    out = jnp.einsum("bhnm,bhmd->bhnd", attn, v)
    out = out.transpose(0, 2, 1, 3).reshape(B, N, inner)
    return jnp.einsum("bnc,cd->bnd", out, w_out) + b_out[0]


if __name__ == "__main__":
    # Small shapes consistent with the module.
    B, N = 2, 8
    input_dim, output_dim = 32, 32
    heads, dim_head = 2, 16
    inner_dim = heads * dim_head

    key = jax.random.PRNGKey(0)
    kx, kw1, kb1, kw2, kb2 = jax.random.split(key, 5)

    x = jax.random.normal(kx, (B, N, input_dim), dtype=jnp.float32)

    # PyTorch Linear stores weight as (out, in); here kept pre-transposed as
    # (in, out) so the forward is x @ W + b.
    w_qkv = jax.random.normal(kw1, (input_dim, 3 * inner_dim), jnp.float32) * 0.02
    b_qkv = jax.random.normal(kb1, (1, 3 * inner_dim), jnp.float32) * 0.02
    w_out = jax.random.normal(kw2, (inner_dim, output_dim), jnp.float32) * 0.02
    b_out = jax.random.normal(kb2, (1, output_dim), jnp.float32) * 0.02

    y = attention_forward(x, w_qkv, b_qkv, w_out, b_out,
                          heads=heads, dim_head=dim_head)
    y = jax.block_until_ready(y)

    y_ref = attention_reference(x, w_qkv, b_qkv, w_out, b_out,
                                heads=heads, dim_head=dim_head)
    # bf16 MXU inputs + approx reciprocal -> compare with loose-ish tolerance.
    np.testing.assert_allclose(np.asarray(y), np.asarray(y_ref),
                               rtol=2e-2, atol=2e-3)

    print("KERNEL_OK")
</pallas_src>

<mosaic_0001>
module attributes {stable_mosaic.version = 11 : i64} {
  func.func @kernel(%arg0: i32, %arg1: i32, %arg2: i32, %arg3: memref<1x8x32xbf16, #tpu.memory_space<vmem>>, %arg4: memref<1x32x32xbf16, #tpu.memory_space<vmem>>, %arg5: memref<1x1x32xf32, #tpu.memory_space<vmem>>, %arg6: memref<1x2x16x8xbf16, #tpu.memory_space<vmem>>, %arg7: memref<1x2x8x16xbf16, #tpu.memory_space<vmem>>, %arg8: memref<32x128xbf16, #tpu.memory_space<vmem>>, %arg9: memref<1x128xf32, #tpu.memory_space<vmem>>, %arg10: memref<1x8x128xf32, #tpu.memory_space<vmem>>, %arg11: memref<8x32xf32, #tpu.memory_space<vmem>>) attributes {dimension_semantics = [#tpu.dimension_semantics<parallel>, #tpu.dimension_semantics<parallel>, #tpu.dimension_semantics<arbitrary>], iteration_bounds = array<i64: 2, 1, 1>, scalar_prefetch = 0 : i64, scratch_operands = 1 : i64, tpu.core_type = #tpu.core_type<tc>, window_params = [{transform_indices = @transform_0, window_bounds = array<i64: 1, 8, 32>}, {transform_indices = @transform_1, window_bounds = array<i64: 1, 32, 32>}, {transform_indices = @transform_2, window_bounds = array<i64: 1, 1, 32>}, {transform_indices = @transform_3, window_bounds = array<i64: 1, 2, 16, 8>}, {transform_indices = @transform_4, window_bounds = array<i64: 1, 2, 8, 16>}, {pipeline_mode = #tpu.pipeline_mode<synchronous>, transform_indices = @transform_5, window_bounds = array<i64: 32, 128>}, {pipeline_mode = #tpu.pipeline_mode<synchronous>, transform_indices = @transform_6, window_bounds = array<i64: 1, 128>}, {transform_indices = @transform_7, window_bounds = array<i64: 1, 8, 128>}]} {
    %c0 = arith.constant 0 : index
    %c0_0 = arith.constant 0 : index
    %c0_1 = arith.constant 0 : index
    %0 = vector.load %arg3[%c0, %c0_0, %c0_1] : memref<1x8x32xbf16, #tpu.memory_space<vmem>>, vector<1x8x32xbf16>
    %1 = vector.shape_cast %0 : vector<1x8x32xbf16> to vector<8x32xbf16>
    %c0_2 = arith.constant 0 : index
    %c0_3 = arith.constant 0 : index
    %c0_4 = arith.constant 0 : index
    %2 = vector.load %arg4[%c0_2, %c0_3, %c0_4] : memref<1x32x32xbf16, #tpu.memory_space<vmem>>, vector<1x32x32xbf16>
    %3 = vector.shape_cast %2 : vector<1x32x32xbf16> to vector<32x32xbf16>
    %cst = arith.constant dense<0.000000e+00> : vector<8x32xf32>
    %4 = tpu.matmul %1, %3, %cst {dimension_numbers = #tpu.dot_dimension_numbers<[1], [0], [0], [1], [0, 0, 1, 1], [], []>} : vector<8x32xbf16>, vector<32x32xbf16>, vector<8x32xf32> -> vector<8x32xf32>
    %c0_5 = arith.constant 0 : index
    %c0_6 = arith.constant 0 : index
    %c0_7 = arith.constant 0 : index
    %5 = vector.load %arg5[%c0_5, %c0_6, %c0_7] : memref<1x1x32xf32, #tpu.memory_space<vmem>>, vector<1x1x32xf32>
    %6 = vector.shape_cast %5 : vector<1x1x32xf32> to vector<1x32xf32>
    %7 = vector.broadcast %6 : vector<1x32xf32> to vector<8x32xf32>
    %8 = arith.addf %4, %7 : vector<8x32xf32>
    %9 = arith.truncf %8 : vector<8x32xf32> to vector<8x32xbf16>
    %10 = vector.extract_strided_slice %9 {offsets = [0, 0], sizes = [8, 16], strides = [1, 1]} : vector<8x32xbf16> to vector<8x16xbf16>
    %c0_8 = arith.constant 0 : index
    %c0_9 = arith.constant 0 : index
    %c0_10 = arith.constant 0 : index
    %c0_11 = arith.constant 0 : index
    %11 = vector.load %arg6[%c0_8, %c0_9, %c0_10, %c0_11] : memref<1x2x16x8xbf16, #tpu.memory_space<vmem>>, vector<1x1x16x8xbf16>
    %12 = vector.shape_cast %11 : vector<1x1x16x8xbf16> to vector<16x8xbf16>
    %cst_12 = arith.constant dense<0.000000e+00> : vector<8x8xf32>
    %13 = tpu.matmul %10, %12, %cst_12 {dimension_numbers = #tpu.dot_dimension_numbers<[1], [0], [0], [1], [0, 0, 1, 1], [], []>} : vector<8x16xbf16>, vector<16x8xbf16>, vector<8x8xf32> -> vector<8x8xf32>
    %cst_13 = arith.constant dense<0xFF800000> : vector<8xf32>
    %14 = vector.multi_reduction <maximumf>, %13, %cst_13 [1] : vector<8x8xf32> to vector<8xf32>
    %15 = vector.shape_cast %14 : vector<8xf32> to vector<8x1xf32>
    %16 = vector.broadcast %15 : vector<8x1xf32> to vector<8x8xf32>
    %17 = arith.subf %13, %16 : vector<8x8xf32>
    %18 = math.exp %17 : vector<8x8xf32>
    %cst_14 = arith.constant dense<0.000000e+00> : vector<8xf32>
    %19 = vector.multi_reduction <add>, %18, %cst_14 [1] : vector<8x8xf32> to vector<8xf32>
    %20 = vector.shape_cast %19 : vector<8xf32> to vector<8x1xf32>
    %21 = tpu.reciprocal %20 {approx = true} : vector<8x1xf32> -> vector<8x1xf32>
    %22 = vector.broadcast %21 : vector<8x1xf32> to vector<8x8xf32>
    %23 = arith.mulf %18, %22 : vector<8x8xf32>
    %24 = arith.truncf %23 : vector<8x8xf32> to vector<8x8xbf16>
    %c0_15 = arith.constant 0 : index
    %c0_16 = arith.constant 0 : index
    %c0_17 = arith.constant 0 : index
    %c0_18 = arith.constant 0 : index
    %25 = vector.load %arg7[%c0_15, %c0_16, %c0_17, %c0_18] : memref<1x2x8x16xbf16, #tpu.memory_space<vmem>>, vector<1x1x8x16xbf16>
    %26 = vector.shape_cast %25 : vector<1x1x8x16xbf16> to vector<8x16xbf16>
    %cst_19 = arith.constant dense<0.000000e+00> : vector<8x16xf32>
    %27 = tpu.matmul %24, %26, %cst_19 {dimension_numbers = #tpu.dot_dimension_numbers<[1], [0], [0], [1], [0, 0, 1, 1], [], []>} : vector<8x8xbf16>, vector<8x16xbf16>, vector<8x16xf32> -> vector<8x16xf32>
    %c0_20 = arith.constant 0 : index
    %c0_21 = arith.constant 0 : index
    %28 = vector.load %arg11[%c0_20, %c0_21] : memref<8x32xf32, #tpu.memory_space<vmem>>, vector<8x16xf32>
    tpu.vector_store %arg11[%c0_20, %c0_21], %27 {strides = array<i32>} : memref<8x32xf32, #tpu.memory_space<vmem>>, vector<8x16xf32>,
    %29 = vector.extract_strided_slice %9 {offsets = [0, 16], sizes = [8, 16], strides = [1, 1]} : vector<8x32xbf16> to vector<8x16xbf16>
    %c0_22 = arith.constant 0 : index
    %c1 = arith.constant 1 : index
    %c0_23 = arith.constant 0 : index
    %c0_24 = arith.constant 0 : index
    %30 = vector.load %arg6[%c0_22, %c1, %c0_23, %c0_24] : memref<1x2x16x8xbf16, #tpu.memory_space<vmem>>, vector<1x1x16x8xbf16>
    %31 = vector.shape_cast %30 : vector<1x1x16x8xbf16> to vector<16x8xbf16>
    %cst_25 = arith.constant dense<0.000000e+00> : vector<8x8xf32>
    %32 = tpu.matmul %29, %31, %cst_25 {dimension_numbers = #tpu.dot_dimension_numbers<[1], [0], [0], [1], [0, 0, 1, 1], [], []>} : vector<8x16xbf16>, vector<16x8xbf16>, vector<8x8xf32> -> vector<8x8xf32>
    %cst_26 = arith.constant dense<0xFF800000> : vector<8xf32>
    %33 = vector.multi_reduction <maximumf>, %32, %cst_26 [1] : vector<8x8xf32> to vector<8xf32>
    %34 = vector.shape_cast %33 : vector<8xf32> to vector<8x1xf32>
    %35 = vector.broadcast %34 : vector<8x1xf32> to vector<8x8xf32>
    %36 = arith.subf %32, %35 : vector<8x8xf32>
    %37 = math.exp %36 : vector<8x8xf32>
    %cst_27 = arith.constant dense<0.000000e+00> : vector<8xf32>
    %38 = vector.multi_reduction <add>, %37, %cst_27 [1] : vector<8x8xf32> to vector<8xf32>
    %39 = vector.shape_cast %38 : vector<8xf32> to vector<8x1xf32>
    %40 = tpu.reciprocal %39 {approx = true} : vector<8x1xf32> -> vector<8x1xf32>
    %41 = vector.broadcast %40 : vector<8x1xf32> to vector<8x8xf32>
    %42 = arith.mulf %37, %41 : vector<8x8xf32>
    %43 = arith.truncf %42 : vector<8x8xf32> to vector<8x8xbf16>
    %c0_28 = arith.constant 0 : index
    %c1_29 = arith.constant 1 : index
    %c0_30 = arith.constant 0 : index
    %c0_31 = arith.constant 0 : index
    %44 = vector.load %arg7[%c0_28, %c1_29, %c0_30, %c0_31] : memref<1x2x8x16xbf16, #tpu.memory_space<vmem>>, vector<1x1x8x16xbf16>
    %45 = vector.shape_cast %44 : vector<1x1x8x16xbf16> to vector<8x16xbf16>
    %cst_32 = arith.constant dense<0.000000e+00> : vector<8x16xf32>
    %46 = tpu.matmul %43, %45, %cst_32 {dimension_numbers = #tpu.dot_dimension_numbers<[1], [0], [0], [1], [0, 0, 1, 1], [], []>} : vector<8x8xbf16>, vector<8x16xbf16>, vector<8x16xf32> -> vector<8x16xf32>
    %c0_33 = arith.constant 0 : index
    %c16 = arith.constant 16 : index
    %47 = vector.load %arg11[%c0_33, %c16] : memref<8x32xf32, #tpu.memory_space<vmem>>, vector<8x16xf32>
    tpu.vector_store %arg11[%c0_33, %c16], %46 {strides = array<i32>} : memref<8x32xf32, #tpu.memory_space<vmem>>, vector<8x16xf32>,
    %c0_i32 = arith.constant 0 : i32
    %48 = arith.cmpi eq, %arg2, %c0_i32 : i32
    %49 = arith.extui %48 : i1 to i32
    %c0_i32_34 = arith.constant 0 : i32
    %50 = arith.cmpi ne, %49, %c0_i32_34 : i32
    scf.if %50 {
      %c0_35 = arith.constant 0 : index
      %c0_36 = arith.constant 0 : index
      %51 = vector.load %arg11[%c0_35, %c0_36] : memref<8x32xf32, #tpu.memory_space<vmem>>, vector<8x32xf32>
      %52 = arith.truncf %51 : vector<8x32xf32> to vector<8x32xbf16>
      %c0_37 = arith.constant 0 : index
      %c0_38 = arith.constant 0 : index
      %53 = vector.load %arg8[%c0_37, %c0_38] : memref<32x128xbf16, #tpu.memory_space<vmem>>, vector<32x128xbf16>
      %cst_39 = arith.constant dense<0.000000e+00> : vector<8x128xf32>
      %54 = tpu.matmul %52, %53, %cst_39 {dimension_numbers = #tpu.dot_dimension_numbers<[1], [0], [0], [1], [0, 0, 1, 1], [], []>} : vector<8x32xbf16>, vector<32x128xbf16>, vector<8x128xf32> -> vector<8x128xf32>
      %c0_40 = arith.constant 0 : index
      %c0_41 = arith.constant 0 : index
      %55 = vector.load %arg9[%c0_40, %c0_41] : memref<1x128xf32, #tpu.memory_space<vmem>>, vector<1x128xf32>
      %56 = vector.broadcast %55 : vector<1x128xf32> to vector<8x128xf32>
      %57 = arith.addf %54, %56 : vector<8x128xf32>
      %c0_42 = arith.constant 0 : index
      %c0_43 = arith.constant 0 : index
      %c0_44 = arith.constant 0 : index
      %58 = vector.load %arg10[%c0_42, %c0_43, %c0_44] : memref<1x8x128xf32, #tpu.memory_space<vmem>>, vector<1x8x128xf32>
      %59 = vector.shape_cast %58 : vector<1x8x128xf32> to vector<8x128xf32>
      %60 = vector.shape_cast %57 : vector<8x128xf32> to vector<1x8x128xf32>
      tpu.vector_store %arg10[%c0_42, %c0_43, %c0_44], %60 {strides = array<i32>} : memref<1x8x128xf32, #tpu.memory_space<vmem>>, vector<1x8x128xf32>,
    } else {
    }
    return
  }
  func.func @transform_0(%arg0: i32, %arg1: i32, %arg2: i32) -> (i32, i32, i32) {
    %c0_i32 = arith.constant 0 : i32
    %c0_i32_0 = arith.constant 0 : i32
    return %arg0, %arg1, %c0_i32 : i32, i32, i32
  }
  func.func @transform_1(%arg0: i32, %arg1: i32, %arg2: i32) -> (i32, i32, i32) {
    %c0_i32 = arith.constant 0 : i32
    %c0_i32_0 = arith.constant 0 : i32
    %c0_i32_1 = arith.constant 0 : i32
    return %arg2, %c0_i32, %c0_i32_0 : i32, i32, i32
  }
  func.func @transform_2(%arg0: i32, %arg1: i32, %arg2: i32) -> (i32, i32, i32) {
    %c0_i32 = arith.constant 0 : i32
    %c0_i32_0 = arith.constant 0 : i32
    %c0_i32_1 = arith.constant 0 : i32
    return %arg2, %c0_i32, %c0_i32_0 : i32, i32, i32
  }
  func.func @transform_3(%arg0: i32, %arg1: i32, %arg2: i32) -> (i32, i32, i32, i32) {
    %c0_i32 = arith.constant 0 : i32
    %c0_i32_0 = arith.constant 0 : i32
    %c0_i32_1 = arith.constant 0 : i32
    return %arg0, %arg2, %c0_i32, %c0_i32_0 : i32, i32, i32, i32
  }
  func.func @transform_4(%arg0: i32, %arg1: i32, %arg2: i32) -> (i32, i32, i32, i32) {
    %c0_i32 = arith.constant 0 : i32
    %c0_i32_0 = arith.constant 0 : i32
    %c0_i32_1 = arith.constant 0 : i32
    return %arg0, %arg2, %c0_i32, %c0_i32_0 : i32, i32, i32, i32
  }
  func.func @transform_5(%arg0: i32, %arg1: i32, %arg2: i32) -> (i32, i32) {
    %c0_i32 = arith.constant 0 : i32
    %c0_i32_0 = arith.constant 0 : i32
    %c0_i32_1 = arith.constant 0 : i32
    return %c0_i32, %c0_i32_0 : i32, i32
  }
  func.func @transform_6(%arg0: i32, %arg1: i32, %arg2: i32) -> (i32, i32) {
    %c0_i32 = arith.constant 0 : i32
    %c0_i32_0 = arith.constant 0 : i32
    %c0_i32_1 = arith.constant 0 : i32
    return %c0_i32, %c0_i32_0 : i32, i32
  }
  func.func @transform_7(%arg0: i32, %arg1: i32, %arg2: i32) -> (i32, i32, i32) {
    %c0_i32 = arith.constant 0 : i32
    %c0_i32_0 = arith.constant 0 : i32
    return %arg0, %arg1, %c0_i32 : i32, i32, i32
  }
}

</mosaic_0001>

<bundles_post_ra>
// kernel: tpu_custom_call.1
= control target key start
LH: loop header
LB: loop body
LE: loop exit
PB: predicated region body
PF: predicated region fallthrough
CT: control target
= control target key end

     0   :  { %12 = vsyncpa [#allocation4], 0  ;;  %s1259_s0 = inlined_call_operand.hbm [shape: bf16[2,8,32], index: 0, kind: input, shape index: {}]   ;;  %s1260_s1 = inlined_call_operand.vmem [shape: bf16[1,32,32], index: 1, kind: input, shape index: {}]   ;;  %s1261_s2 = inlined_call_operand.vmem [shape: f32[1,1,32], index: 2, kind: input, shape index: {}]   ;;  %s1262_s3 = inlined_call_operand.vmem [shape: bf16[2,2,16,8], index: 3, kind: input, shape index: {}]   ;;  %s1263_s4 = inlined_call_operand.vmem [shape: bf16[2,2,8,16], index: 4, kind: input, shape index: {}]   ;;  %s1264_s5 = inlined_call_operand.vmem [shape: bf16[32,128], index: 5, kind: input, shape index: {}]   ;;  %s1265_s6 = inlined_call_operand.vmem [shape: f32[1,128], index: 6, kind: input, shape index: {}]   ;;  %s1266_s7 = inlined_call_operand.hbm [shape: f32[2,8,128], index: 7, kind: output, shape index: {}]  }
   0x1   :  { %14 = vsyncpa [#allocation4 + $0x1], 0 }
   0x2   :  { %15 = vsyncpa [#allocation5], 0 }
   0x3   :  { %17 = vsyncpa [#allocation5 + $0x1], 0  ;;  %s1097_s24 = smov 0   ;;  %s1099_s25 = smov 0  }
   0x4   :  { %s1101_s26 = smov 0   ;;  %s1103_s27 = smov 0  }
   0x5   :  { %s1105_s28 = smov 0   ;;  %s1107_s29 = smov 0  }
   0x6 LB: > { %s807_s30 = sadd.s32 4294967295, %s1053_s29   ;;  %s808_s8 = sadd.s32 4294967294, %s1053_s29   ;;  %s1053_s29 = sphi %s1107_s29, %s23_s29   ;;  %s1049_s28 = sphi %s1105_s28, %s1275_s28   ;;  %s1045_s27 = sphi %s1103_s27, %s1274_s27   ;;  %s1041_s26 = sphi %s1101_s26, %s1273_s26   ;;  %s1037_s25 = sphi %s1099_s25, %s1272_s25   ;;  %s1033_s24 = sphi %s1097_s24, %s1271_s24  }
   0x7   : > { %s42_s9 = sadd.s32 1, %s1049_s28  ;;  %s51_s10 = sadd.s32 1, %s1041_s26 }
   0x8   : > { %p44_p0 = scmp.ge.s32.totalorder %s42_s9, 2  ;;  %p58_p1 = scmp.ne.s32.totalorder %s1041_s26, %s1037_s25 }
   0x9   : > { %p59_p2 = scmp.eq.s32.totalorder %s1053_s29, 0  ;;  %p64_p3 = scmp.ne.s32.totalorder %s1037_s25, %s1033_s24 }
   0xa   : > { %s1277_s9 = smov (%p44_p0, %s42_s9), 0  ;;  %p65_p5 = scmp.eq.s32.totalorder %s807_s30, 0 }
   0xb   : > { %p1138_p4 = por %p59_p2, %p58_p1  ;;  %s46_s12 = ssub.s32 %s1049_s28, %s1277_s9 }
   0xc   : > { %p240_p6 = scmp.eq.s32.totalorder %s807_s30, 1  ;;  %p49_p7 = scmp.eq.s32.totalorder %s46_s12, 0 }
   0xd   : > { %p1144_p8 = por %p65_p5, %p64_p3  ;;  %p246_p10 = scmp.eq.s32.totalorder %s808_s8, 1 }
   0xe   : > { %p1148_p9 = por %p240_p6, %p58_p1  ;;  %p812_p12 = scmp.ge.s32.totalorder %s1053_s29, 2 }
   0xf   : > { %s1153_s15 = scalar_select %p49_p7, %s1041_s26, %s51_s10  }
  0x10   : > { %p1155_p11 = por %p246_p10, %p64_p3  ;;  %p879_p13 = scmp.lt.s32.totalorder %s1053_s29, 2 }
  0x11   : > { %s286_s17 = sand.u32 1, %s1041_s26   ;;  %s814_s19 = sshll.u32 %s1049_s28, 2 }
  0x12   : > { %s813_s18 = sshll.u32 %s286_s17, 2  ;;  %s295_s22 = scalar_lea.hbm %s1259_s0, %s814_s19 }
  0x13   : > { %s290_s23 = scalar_lea.vmem [#allocation3], %s813_s18  ;;  %s297_s12 = sshll.u32 %s295_s22, 4  ;;  %s298_s12 = int_to_ptr.hbm [resolvable:$true] %s297_s12 }
  0x14   : > { %s299_s30 = sshll.u32 %s290_s23, 4  ;;  %p872_p0 = pnand %p879_p13, %p1138_p4  ;;  %s300_s30 = int_to_ptr.vmem [resolvable:$true] %s299_s30 }
  0x15   : > { %p815_p1 = scmp.ge.s32.totalorder %s1053_s29, 1  ;;  %p331_p2 = scmp.lt.s32.totalorder %s1053_s29, 3 }
  0x16   : > { %s287_s8 = scalar_lea.sflag [#allocation4], %s286_s17 }
  0x17   : > { %874 = dma.hbm_to_vmem [thread:$0]  (!%p872_p0), %s298_s12, 64, %s300_s30, %s287_s8  }
  0x18   : > { %p332_p3 = pnand %p815_p1, %p331_p2 }
  0x19   : > { %s1171_s10 = sand.u32 (!%p332_p3), 1, %s1037_s25  }
  0x1a   : > { %335 = sbr.rel (%p332_p3) target bundleno = 1044 (0x414), region = 48  ;;  %s816_s19 = sshll.u32 (!%p332_p3), %s1171_s10, 2 }
  0x1b   : > { %s338_s18 = scalar_lea.sflag (!%p332_p3), [#allocation4], %s1171_s10  ;;  %s341_s20 = scalar_lea.vmem (!%p332_p3), [#allocation3], %s816_s19 }
  0x1f   : > { %1024 = dma.done.wait (%p1144_p8), %s338_s18, 64  }
  0x20   : > { %1026 = vsyncadd (%p1144_p8), %s338_s18, 4294967232  ;;  %v862_v0 = vld [vmem:[%s1260_s1 + $0x8] sm:$0xff]  ;;  %v861_v1 = vld [vmem:[%s1260_s1] sm:$0xff]  ;;  %vm451_vm0 = vcmask 261120   ;;  %p409_p4 = scmp.lt.s32.totalorder %s1045_s27, 1  ;;  %vm477_vm1 = vcmask 130048  }
  0x21   : > { %461 = vmatpush.bf16.msra.mxu0 %v862_v0  ;;  %v430_v2 = vld [vmem:[%s341_s20] sm:$0xf]  ;;  %v931_v5 = vld [vmem:[%s1261_s2] ss:$0 sm:$0xff]  ;;  %s1055_s20 = smov 112   ;;  %vm494_vm2 = vcmask 64512  }
  0x22   : > { %s1188_s23 = scalar_select %p409_p4, %s1045_s27, 1  ;;  %vm511_vm3 = vcmask 1043456   ;;  %v866_v43 = vld [vmem:[%s1264_s5 + $0x8] sm:$0xff]  ;;  %v865_v46 = vld [vmem:[%s1264_s5] sm:$0xff]  ;;  %vm596_vm4 = vcmask 261248  }
  0x23   : > { %s1056_s30 = smov 16   ;;  %s856_s19 = sshll.u32 %s1045_s27, 3  ;;  %v932_v50 = vld [vmem:[%s1265_s6] ss:$0 sm:$0xff] }
  0x24   : > { %s859_s13 = sshll.u32 %s1188_s23, 4  ;;  %s860_s11 = sshll.u32 %s1188_s23, 3 }
  0x25   : > { %462 = vmatpush.bf16.msra.mxu0 %v861_v1  ;;  %s417_s8 = scalar_lea.vmem %s1262_s3, %s859_s13  ;;  %s427_s22 = scalar_lea.vmem %s1263_s4, %s860_s11 }
  0x26   : > { %v863_v3 = vld [vmem:[%s417_s8] sm:$0xff]  ;;  %v864_v4 = vld [vmem:[%s417_s8 + $0x8] sm:$0xff]  ;;  %s817_s18 = sshll.u32 %s1171_s10, 3  ;;  %s653_s21 = scalar_lea.hbm %s1266_s7, %s856_s19 }
  0x27   : > { %488 = vmatpush.bf16.msra.mxu1 %v863_v3  ;;  %553 = vmatpush.bf16.msra.mxu3 %v864_v4  ;;  %v507_v24 = vld [vmem:[%s427_s22] sm:$0xf]  ;;  %v844_v26 = vld [vmem:[%s427_s22 + $0x4] sm:$0xf]  ;;  %s399_s23 = scalar_lea.vmem [#allocation6], %s817_s18  ;;  %s642_s12 = scalar_lea.sflag [#allocation5], %s1171_s10 }
  0x28   : > { %830 = vmatmul.msk.bf16.vlgmr.msra.gmra.mxu0 %vm451_vm0, %v430_v2  ;;  %v513_v25 = vsel %vm511_vm3, %v507_v24, 0  ;;  %v577_v27 = vsel %vm511_vm3, %v844_v26, 0  ;;  %s655_s13 = sshll.u32 %s399_s23, 4  ;;  %s991_s11 = scalar_lea.hbm %s1266_s7, 16  ;;  %s656_s13 = int_to_ptr.vmem [resolvable:$true] %s655_s13 }
  0x29   : > { %522 = vmatpush.bf16.msra.mxu2 %v513_v25 }
  0x2b   : > { %586 = vmatpush.bf16.msrb.mxu1 %v577_v27 }
  0x2d   : > { %633 = vmatpush.bf16.msrb.mxu2 %v866_v43 }
  0x31   : > { %634 = vmatpush.bf16.msrb.mxu2 %v865_v46 }
  0xa5   : > { %v464_v6 = vpop.f32.mrf.mxu0 }
  0xa6   : > { %v465_v7 = vadd.f32 %v931_v5, %v464_v6 }
  0xa8   : > { %v468_v8 = vpack.c.bf16 %v465_v7, %v465_v7 }
  0xaa   : > { %835 = vmatmul.msk.bf16.vlgmr.msra.gmra.mxu1 %vm477_vm1, %v468_v8  ;;  %v533_v9 = vunpack.c.l.b16 %v468_v8 }
  0xac   : > { %v534_v10 = vpack.c.b16 %v533_v9, %v533_v9 }
  0xad   : > { %v466_v11 = vpop.f32.mrf.mxu0 }
  0xae   : > { %535 = vrot.lane.b32.xlu0 %v534_v10, %s1055_s20 }
 0x120   : > { %v536_v12 = vpop.permute.xlu0 %535 }
 0x121   : > { %843 = vmatmul.msk.bf16.vlgmr.msra.gmra.mxu3 %vm477_vm1, %v536_v12 }
 0x127   : > { %v490_v13 = vpop.f32.mrf.mxu1 }
 0x128   : > { %v495_v14 = vsel %vm494_vm2, %v490_v13, -inf }
 0x129   : > { %496 = vmax.xlane.f32.xlu1 %v495_v14 }
 0x12f   : > { %v492_v15 = vpop.f32.mrf.mxu1 }
 0x19c   : > { %v497_v16 = vpop.xlane.xlu1 %496 }
 0x19d   : > { %v498_v17 = vsub.f32 %v490_v13, %v497_v16 }
 0x19f   : > { %v499_v18 = vmul.f32 1.442695, %v498_v17 }
 0x1a1   : > { %933 = vpow2.f32 %v499_v18 }
 0x1a4   : > { %v555_v19 = vpop.f32.mrf.mxu3 }
 0x1a5   : > { %v559_v20 = vsel %vm494_vm2, %v555_v19, -inf }
 0x1a6   : > { %560 = vmax.xlane.f32.xlu0 %v559_v20 }
 0x1a7   : > { %v934_v21 = vpop.eup %933 }
 0x1a8   : > { %v501_v22 = vsel %vm494_vm2, %v934_v21, 0.0 }
 0x1a9   : > { %502 = vadd.xlane.f32.xlu2 %v501_v22 }
 0x1ac   : > { %v557_v23 = vpop.f32.mrf.mxu3 }
 0x219   : > { %v561_v28 = vpop.xlane.xlu0 %560 }
 0x21a   : > { %v562_v29 = vsub.f32 %v555_v19, %v561_v28 }
 0x21c   : > { %v563_v30 = vmul.f32 1.442695, %v562_v29  ;;  %v503_v31 = vpop.xlane.xlu2 %502 }
 0x21d   : > { %935 = vrcp.f32 %v503_v31 }
 0x21e   : > { %937 = vpow2.f32 %v563_v30 }
 0x223   : > { %v936_v32 = vpop.eup %935 }
 0x224   : > { %v938_v33 = vpop.eup %937  ;;  %v505_v34 = vmul.f32 %v936_v32, %v934_v21 }
 0x225   : > { %v565_v35 = vsel %vm494_vm2, %v938_v33, 0.0 }
 0x226   : > { %566 = vadd.xlane.f32.xlu1 %v565_v35  ;;  %v506_v36 = vpack.c.bf16 %v505_v34, %v505_v34 }
 0x228   : > { %836 = vmatmul.msk.bf16.vlgmr.msra.gmra.mxu2 %vm494_vm2, %v506_v36 }
 0x299   : > { %v567_v37 = vpop.xlane.xlu1 %566 }
 0x29a   : > { %939 = vrcp.f32 %v567_v37 }
 0x2a0   : > { %v940_v38 = vpop.eup %939 }
 0x2a1   : > { %v569_v39 = vmul.f32 %v940_v38, %v938_v33 }
 0x2a3   : > { %v570_v40 = vpack.c.bf16 %v569_v39, %v569_v39 }
 0x2a5   : > { %845 = vmatmul.msk.bf16.vlgmr.msrb.gmra.mxu1 %vm494_vm2, %v570_v40 }
 0x2ab   : > { %v524_v41 = vpop.f32.mrf.mxu2 }
 0x2ac   : > { %528 = vst.msk [vmem:[#allocation2] sm:$0xff] %vm477_vm1, %v524_v41 }
 0x2b3   : > { %v526_v42 = vpop.f32.mrf.mxu2 }
 0x322   : > { %v588_v44 = vpop.f32.mrf.mxu1 }
 0x323   : > { %593 = vrot.lane.b32.xlu2 %v588_v44, %s1056_s30  ;;  %s657_s30 = sshll.u32 %s653_s21, 4  ;;  %s658_s30 = int_to_ptr.hbm [resolvable:$true] %s657_s30 }
 0x324   : > { %s985_s27 = sshra.s32 %s658_s30, 4  ;;  %s986_s27 = int_to_ptr.hbm [resolvable:$true] %s985_s27 }
 0x325   : > { %s987_s8 = scalar_lea.hbm %s986_s27, 8  ;;  %p992_p8 = scmp.lt.s32.totalorder %s986_s27, %s1266_s7 }
 0x326   : > { %p988_p5 = scmp.ne.s32.totalorder %s986_s27, %s987_s8  ;;  %p993_p10 = scmp.lt.s32.totalorder %s991_s11, %s987_s8 }
 0x328   : > { %p989_p6 = pnand %p988_p5, %p1148_p9  ;;  %p994_p13 = por %p993_p10, %p992_p8 }
 0x32a   : > { %v590_v45 = vpop.f32.mrf.mxu1  ;;  %p990_p7 = pneg %p989_p6 }
 0x32c   : > { %p995_p0 = pnand %p994_p13, %p990_p7 }
 0x37d   : > { %v594_v47 = vpop.permute.xlu2 %593 }
 0x37e   : > { %597 = vst.msk [vmem:[#allocation2] sm:$0xff] %vm596_vm4, %v594_v47 }
 0x385   : > { %v602_v48 = vld [vmem:[#allocation2] sm:$0xff] }
 0x386   : > { %v603_v49 = vpack.c.bf16 %v602_v48, %v602_v48 }
 0x388   : > { %854 = vmatmul.msk.bf16.vlgmr.msrb.gmra.mxu2 %vm451_vm0, %v603_v49 }
 0x40b   : > { %v636_v51 = vpop.f32.mrf.mxu2 }
 0x40c   : > { %v637_v52 = vadd.f32 %v932_v50, %v636_v51 }
 0x40e   : > { %640 = vst [vmem:[%s399_s23] sm:$0xff] %v637_v52 }
 0x40f   : > { %998 = shalt.err (!%p995_p0)
}
 0x410   : > { %869 = dma.vmem_to_hbm [thread:$0]  (%p1148_p9), %s656_s13, 128, %s658_s30, %s642_s12  }
 0x413   : > { %v638_v53 = vpop.f32.mrf.mxu2 }
 0x414 PF: > { %s669_s10 = sand.u32 1, %s1033_s24   ;;  %p876_p1 = pnand %p812_p12, %p1155_p11 }
 0x415   : > { %s670_s21 = scalar_lea.sflag [#allocation5], %s669_s10 }
 0x416   : > { %p877_p2 = pneg %p876_p1 }
 0x418   : > { %1028 = dma.done.wait (%p877_p2), %s670_s21, 128  }
 0x419   : > { %1030 = vsyncadd (%p877_p2), %s670_s21, 4294967168  ;;  %s23_s29 = sadd.s32 1, %s1053_s29   ;;  %s1271_s24 = smov %s1037_s25 }
 0x41a   : > { %p20_p3 = scmp.ge.s32.totalorder %s23_s29, 4   ;;  %s1272_s25 = smov %s1041_s26 }
 0x41b   : > { %s1273_s26 = smov %s1153_s15  ;;  %s1274_s27 = smov %s1049_s28 }
 0x41c   : > { %s1275_s28 = smov %s1277_s9  ;;  %22 = sbr.rel (!%p20_p3) target bundleno = 6 (0x6), region = 111 }
 0x421   :  { %676 = vsyncpa [#allocation4], 1 }
 0x422   :  { %678 = vsyncpa [#allocation4 + $0x1], 1 }
 0x423   :  { %679 = vsyncpa [#allocation5], 1 }
 0x424   :  { %681 = vsyncpa [#allocation5 + $0x1], 1 }

</bundles_post_ra>
